<compile_context>
chip_gen: v5e
topology: v5e:2x2
jax: 0.10.0
libtpu: 0.0.40
codegen_flags: <defaults>
</compile_context>

<pallas_src>
import math
import functools

import jax
import jax.numpy as jnp
from jax import lax
from jax.experimental import pallas as pl
from jax.experimental.pallas import tpu as pltpu


def _slstm_kernel(
    seq_ref, st_ref,
    ln_g_ref, ln_b_ref,
    wr_ref, wb_ref,
    gn_g_ref, gn_b_ref, grp_ref, grp_t_ref,
    up_w_ref, up_b_ref, dn_w_ref, dn_b_ref,
    out_ref, st_out_ref,
    *, head_dim, hidden, proj_dim,
):
    eps = 1e-5
    H = hidden
    P = proj_dim

    seq = seq_ref[...]                                    # (TB, D)  f32
    st = st_ref[...]                                      # (TB, 4H) f32, [c|n|h|m]
    c_tm1 = st[:, 0 * H:1 * H]
    n_tm1 = st[:, 1 * H:2 * H]
    h_tm1 = st[:, 2 * H:3 * H]
    m_tm1 = st[:, 3 * H:4 * H]

    # ---- LayerNorm(inp_dim) (f32) ----
    mu = jnp.mean(seq, axis=-1, keepdims=True)
    var = jnp.mean((seq - mu) ** 2, axis=-1, keepdims=True)
    x_t = (seq - mu) * lax.rsqrt(var + eps) * ln_g_ref[...] + ln_b_ref[...]

    # ---- fused gate GEMM: [x_t | h_tm1] @ [W ; R] + b  (K = D + H) ----
    xh = jnp.concatenate([x_t, h_tm1], axis=-1).astype(wr_ref.dtype)   # bf16 MXU operand
    gates = (jnp.dot(xh, wr_ref[...], preferred_element_type=jnp.float32)
             + wb_ref[...])
    i_t = gates[:, 0 * H:1 * H]
    f_t = gates[:, 1 * H:2 * H]
    z_t = gates[:, 2 * H:3 * H]
    o_t = gates[:, 3 * H:4 * H]

    # ---- exponential gating with stabilizer state (f32) ----
    m_t = jnp.maximum(f_t + m_tm1, i_t)
    i_e = jnp.exp(i_t - m_t)
    f_e = jnp.exp(f_t - m_t + m_tm1)
    z_a = jnp.tanh(z_t)
    o_a = jax.nn.sigmoid(o_t)

    c_t = f_e * c_tm1 + i_e * z_a
    n_t = f_e * n_tm1 + i_e
    h_t = o_a * (c_t * pl.reciprocal(n_t, approx=True))

    # ---- GroupNorm(head_num, H) via one-hot matmuls.  Variance is computed as
    # E[(h - mean)^2] (sum of non-negative terms) so rsqrt never sees a negative. ----
    G = grp_ref[...]                                      # (H, head_num) one-hot f32
    Gt = grp_t_ref[...]                                   # (head_num, H)
    inv_hd = 1.0 / float(head_dim)
    mean_g = jnp.dot(h_t, G, preferred_element_type=jnp.float32) * inv_hd
    mean_c = jnp.dot(mean_g, Gt, preferred_element_type=jnp.float32)
    d = h_t - mean_c
    var_g = jnp.dot(d * d, G, preferred_element_type=jnp.float32) * inv_hd
    var_c = jnp.dot(var_g, Gt, preferred_element_type=jnp.float32)
    hn = d * lax.rsqrt(var_c + eps) * gn_g_ref[...] + gn_b_ref[...]

    # ---- up_proj -> (out1 + gelu(out2)) -> down_proj (bf16 MXU, f32 elsewhere) ----
    up = jnp.dot(hn.astype(up_w_ref.dtype), up_w_ref[...],
                 preferred_element_type=jnp.float32) + up_b_ref[...]
    out1 = up[:, :P]
    out2 = up[:, P:]
    mixed = out1 + jax.nn.gelu(out2, approximate=True)    # tanh-approx GELU -> EUP
    down = jnp.dot(mixed.astype(dn_w_ref.dtype), dn_w_ref[...],
                   preferred_element_type=jnp.float32) + dn_b_ref[...]

    out_ref[...] = (down + seq).astype(out_ref.dtype)

    # lane-dense packed state writeback [c|n|h|m] (single full-block store)
    st_out_ref[...] = jnp.concatenate([c_t, n_t, h_t, m_t], axis=-1)


_WEIGHT_NAMES = ("ln_g", "ln_b", "wr", "wb", "gn_g", "gn_b",
                 "grp", "grp_t", "up_w", "up_b", "dn_w", "dn_b")


def _round_up(x, m):
    return ((x + m - 1) // m) * m


def pack_kernel_params(params, *, head_dim, head_num, mxu_dtype=jnp.bfloat16):
    """Pre-pack / pre-cast weights once: bf16 MXU operands ([W;R] fused), f32 affine."""
    H = head_dim * head_num
    grp = (jnp.arange(H)[:, None] // head_dim
           == jnp.arange(head_num)[None, :]).astype(jnp.float32)
    f32 = lambda a: jnp.asarray(a, jnp.float32)
    wr = jnp.concatenate([f32(params["w"]), f32(params["r"])], axis=0).astype(mxu_dtype)
    return dict(
        ln_g=f32(params["ln_g"]), ln_b=f32(params["ln_b"]),
        wr=wr, wb=f32(params["wb"]),
        gn_g=f32(params["gn_g"]), gn_b=f32(params["gn_b"]),
        grp=grp, grp_t=grp.T,
        up_w=params["up_w"].astype(mxu_dtype), up_b=f32(params["up_b"]),
        dn_w=params["dn_w"].astype(mxu_dtype), dn_b=f32(params["dn_b"]),
    )


def slstm_plan(batch, kparams, *, tile_b=None):
    """Pick batch tile, padded batch and a VMEM budget once per (batch, weights)."""
    weight_bytes = sum(int(kparams[k].size) * kparams[k].dtype.itemsize
                       for k in _WEIGHT_NAMES)
    if tile_b is None:
        # >= 2 grid steps so ("parallel",) can shard across v7x's 2 TensorCores;
        # cap the tile when resident weights are large (v7x has 64 MiB VMEM / TC).
        cap = 128 if weight_bytes > (24 << 20) else 256
        tile_b = min(cap, _round_up(max(1, -(-batch // 2)), 8))
    TB = max(8, _round_up(min(int(tile_b), max(batch, 1)), 8))
    n_tiles = -(-batch // TB)
    B_pad = n_tiles * TB

    H4 = kparams["wr"].shape[1]          # 4*H
    D = kparams["dn_w"].shape[1]
    P2 = kparams["up_w"].shape[1]        # 2*P
    tile_bytes = 16 * TB * (D + H4) + 8 * TB * (H4 + P2 + D)   # dbl-buf I/O + temps
    vmem_limit = int(min(max(2 * weight_bytes + tile_bytes + (8 << 20), 16 << 20),
                         64 << 20))
    return dict(TB=TB, n_tiles=n_tiles, B_pad=B_pad, vmem_limit=vmem_limit)


def init_packed_state(hid, batch, batch_pad, hidden):
    """Build the packed (B_pad, 4H) = [c|n|h|m] state once (pad n with 1)."""
    c0, n0, h0, m0 = hid

    def prep(s, pad_val=0.0):
        s = jnp.asarray(s, jnp.float32)
        if s.ndim == 1:                       # init_hidden-style (H,) -> per-sample
            s = jnp.broadcast_to(s[None, :], (batch, hidden))
        return jnp.pad(s, ((0, batch_pad - s.shape[0]), (0, 0)),
                       constant_values=pad_val)

    return jnp.concatenate([prep(c0), prep(n0, 1.0), prep(h0), prep(m0)], axis=-1)


def unpack_state(st_packed, batch, hidden):
    H = hidden
    return tuple(st_packed[:batch, k * H:(k + 1) * H] for k in range(4))


def slstm_step(seq, st_packed, kparams, *, head_dim, head_num, plan,
               out_dtype=jnp.float32):
    """One sLSTM step. `st_packed` is the padded packed state and is updated in
    place (input_output_aliases); pass the returned state to the next step.
    out_dtype=jnp.bfloat16 halves the residual-output HBM writeback if acceptable."""
    B, D = seq.shape
    H = head_dim * head_num
    P = kparams["dn_w"].shape[0]
    TB, n_tiles, B_pad = plan["TB"], plan["n_tiles"], plan["B_pad"]
    assert st_packed.shape == (B_pad, 4 * H)

    seq_p = jnp.asarray(seq, jnp.float32)
    if B_pad != B:
        seq_p = jnp.pad(seq_p, ((0, B_pad - B), (0, 0)))

    weights = [kparams[k] for k in _WEIGHT_NAMES]

    def resident(x):   # stays in VMEM across the whole batch grid
        return pl.BlockSpec(x.shape, lambda i: (0,) * x.ndim)

    in_specs = [
        pl.BlockSpec((TB, D), lambda i: (i, 0)),
        pl.BlockSpec((TB, 4 * H), lambda i: (i, 0)),
    ] + [resident(x) for x in weights]

    out_shape = (
        jax.ShapeDtypeStruct((B_pad, D), out_dtype),
        jax.ShapeDtypeStruct((B_pad, 4 * H), jnp.float32),
    )
    out_specs = (
        pl.BlockSpec((TB, D), lambda i: (i, 0)),
        pl.BlockSpec((TB, 4 * H), lambda i: (i, 0)),
    )

    kernel = functools.partial(_slstm_kernel, head_dim=head_dim, hidden=H, proj_dim=P)
    out_p, st_new = pl.pallas_call(
        kernel,
        grid=(n_tiles,),
        in_specs=in_specs,
        out_specs=out_specs,
        out_shape=out_shape,
        input_output_aliases={1: 1},       # packed state updated in place
        compiler_params=pltpu.CompilerParams(
            dimension_semantics=("parallel",),
            vmem_limit_bytes=plan["vmem_limit"],
        ),
    )(seq_p, st_packed, *weights)

    out = out_p if B_pad == B else out_p[:B]
    return out, st_new


def make_params(key, inp_dim, head_dim, head_num, p_factor=4.0 / 3.0):
    H = head_dim * head_num
    P = int(p_factor * H)
    ks = jax.random.split(key, 16)
    s = 0.05

    def rnd(k, shape):
        return (s * jax.random.normal(k, shape)).astype(jnp.float32)

    # W_i, W_f, W_z, W_o pre-transposed to (D, H), concatenated -> (D, 4H)
    w = jnp.concatenate([rnd(ks[i], (inp_dim, H)) for i in range(4)], axis=-1)
    wb = jnp.concatenate([rnd(ks[4 + i], (1, H)) for i in range(4)], axis=-1)

    # block-diagonal recurrent matrices R_i, R_f, R_z, R_o -> (H, 4H)
    def block_diag(k):
        blocks = jax.random.split(k, head_num)
        mats = [rnd(bk, (head_dim, head_dim)) for bk in blocks]
        return jax.scipy.linalg.block_diag(*mats).astype(jnp.float32)

    r = jnp.concatenate([block_diag(ks[8 + i]) for i in range(4)], axis=-1)

    return dict(
        ln_g=jnp.ones((1, inp_dim), jnp.float32),
        ln_b=jnp.zeros((1, inp_dim), jnp.float32),
        w=w, wb=wb, r=r,
        gn_g=jnp.ones((1, H), jnp.float32),
        gn_b=jnp.zeros((1, H), jnp.float32),
        up_w=rnd(ks[12], (H, 2 * P)),
        up_b=rnd(ks[13], (1, 2 * P)),
        dn_w=rnd(ks[14], (P, inp_dim)),
        dn_b=rnd(ks[15], (1, inp_dim)),
    )


def slstm_reference(seq, hid, params, *, head_dim, head_num, mxu_dtype=None):
    """Pure-JAX reference mirroring the PyTorch forward (use_conv=False, exact GELU,
    exact division).  If mxu_dtype is given, matmul operands are cast to it."""
    eps = 1e-5
    c0, n0, h0, m0 = hid
    H = head_dim * head_num
    P = params["dn_w"].shape[0]

    def mm(a, b):
        if mxu_dtype is not None:
            a = a.astype(mxu_dtype)
            b = b.astype(mxu_dtype)
        return jnp.dot(a, b, preferred_element_type=jnp.float32)

    mu = jnp.mean(seq, -1, keepdims=True)
    var = jnp.mean((seq - mu) ** 2, -1, keepdims=True)
    x_t = (seq - mu) / jnp.sqrt(var + eps) * params["ln_g"] + params["ln_b"]
    gates = mm(x_t, params["w"]) + params["wb"] + mm(jnp.atleast_2d(h0), params["r"])
    i_t, f_t, z_t, o_t = [gates[:, k * H:(k + 1) * H] for k in range(4)]
    m_t = jnp.maximum(f_t + m0, i_t)
    i_e = jnp.exp(i_t - m_t)
    f_e = jnp.exp(f_t - m_t + m0)
    c_t = f_e * c0 + i_e * jnp.tanh(z_t)
    n_t = f_e * n0 + i_e
    h_t = jax.nn.sigmoid(o_t) * (c_t / n_t)
    B = seq.shape[0]
    hg = h_t.reshape(B, head_num, head_dim)
    gm = jnp.mean(hg, -1, keepdims=True)
    gv = jnp.mean((hg - gm) ** 2, -1, keepdims=True)
    hn = ((hg - gm) / jnp.sqrt(gv + eps)).reshape(B, H) * params["gn_g"] + params["gn_b"]
    up = mm(hn, params["up_w"]) + params["up_b"]
    o1, o2 = up[:, :P], up[:, P:]
    mixed = o1 + 0.5 * o2 * (1.0 + lax.erf(o2 / math.sqrt(2.0)))
    out = mm(mixed, params["dn_w"]) + params["dn_b"]
    return out + seq, (c_t, n_t, h_t, m_t)


if __name__ == "__main__":
    inp_dim, head_dim, head_num, batch = 32, 8, 4, 32
    H = head_dim * head_num

    key = jax.random.PRNGKey(0)
    k1, k2, k_par = jax.random.split(key, 3)
    seq1 = jax.random.normal(k1, (batch, inp_dim), dtype=jnp.float32)
    seq2 = jax.random.normal(k2, (batch, inp_dim), dtype=jnp.float32)
    params = make_params(k_par, inp_dim, head_dim, head_num)
    kparams = pack_kernel_params(params, head_dim=head_dim, head_num=head_num,
                                 mxu_dtype=jnp.bfloat16)

    # init_hidden(): (c_0, n_0, h_0, m_0) as (H,) vectors (broadcast to per-sample)
    hid0 = (
        jnp.zeros((H,), jnp.float32),
        jnp.ones((H,), jnp.float32),
        jnp.zeros((H,), jnp.float32),
        jnp.zeros((H,), jnp.float32),
    )

    plan = slstm_plan(batch, kparams)            # batch=32 -> TB=16, grid=(2,)
    st = init_packed_state(hid0, batch, plan["B_pad"], H)

    step = functools.partial(slstm_step, kparams=kparams, head_dim=head_dim,
                             head_num=head_num, plan=plan)

    out1, st = step(seq1, st)
    hid1 = unpack_state(st, batch, H)
    out2, st = step(seq2, st)                    # per-sample recurrent packed state
    hid2 = unpack_state(st, batch, H)
    jax.block_until_ready((out1, out2) + tuple(hid2))

    ref = functools.partial(slstm_reference, head_dim=head_dim, head_num=head_num,
                            mxu_dtype=jnp.bfloat16)
    r_out1, r_hid1 = ref(seq1, hid0, params)
    r_out2, r_hid2 = ref(seq2, r_hid1, params)

    checks = [(out1, r_out1), (out2, r_out2)] + list(zip(hid1, r_hid1)) + list(zip(hid2, r_hid2))
    for a, b in checks:
        assert a.shape == b.shape, f"shape mismatch {a.shape} vs {b.shape}"
        assert jnp.allclose(a, b, rtol=2e-2, atol=2e-2), "mismatch vs reference"

    print("KERNEL_OK")
</pallas_src>

<mosaic_0001>
module attributes {stable_mosaic.version = 11 : i64} {
  func.func @_slstm_kernel(%arg0: i32, %arg1: memref<16x32xf32, #tpu.memory_space<vmem>>, %arg2: memref<16x128xf32, #tpu.memory_space<vmem>>, %arg3: memref<1x32xf32, #tpu.memory_space<vmem>>, %arg4: memref<1x32xf32, #tpu.memory_space<vmem>>, %arg5: memref<64x128xbf16, #tpu.memory_space<vmem>>, %arg6: memref<1x128xf32, #tpu.memory_space<vmem>>, %arg7: memref<1x32xf32, #tpu.memory_space<vmem>>, %arg8: memref<1x32xf32, #tpu.memory_space<vmem>>, %arg9: memref<32x4xf32, #tpu.memory_space<vmem>>, %arg10: memref<4x32xf32, #tpu.memory_space<vmem>>, %arg11: memref<32x84xbf16, #tpu.memory_space<vmem>>, %arg12: memref<1x84xf32, #tpu.memory_space<vmem>>, %arg13: memref<42x32xbf16, #tpu.memory_space<vmem>>, %arg14: memref<1x32xf32, #tpu.memory_space<vmem>>, %arg15: memref<16x32xf32, #tpu.memory_space<vmem>>, %arg16: memref<16x128xf32, #tpu.memory_space<vmem>>) attributes {dimension_semantics = [#tpu.dimension_semantics<parallel>], iteration_bounds = array<i64: 2>, scalar_prefetch = 0 : i64, scratch_operands = 0 : i64, tpu.core_type = #tpu.core_type<tc>, window_params = [{transform_indices = @transform_0, window_bounds = array<i64: 16, 32>}, {transform_indices = @transform_1, window_bounds = array<i64: 16, 128>}, {pipeline_mode = #tpu.pipeline_mode<synchronous>, transform_indices = @transform_2, window_bounds = array<i64: 1, 32>}, {pipeline_mode = #tpu.pipeline_mode<synchronous>, transform_indices = @transform_3, window_bounds = array<i64: 1, 32>}, {pipeline_mode = #tpu.pipeline_mode<synchronous>, transform_indices = @transform_4, window_bounds = array<i64: 64, 128>}, {pipeline_mode = #tpu.pipeline_mode<synchronous>, transform_indices = @transform_5, window_bounds = array<i64: 1, 128>}, {pipeline_mode = #tpu.pipeline_mode<synchronous>, transform_indices = @transform_6, window_bounds = array<i64: 1, 32>}, {pipeline_mode = #tpu.pipeline_mode<synchronous>, transform_indices = @transform_7, window_bounds = array<i64: 1, 32>}, {pipeline_mode = #tpu.pipeline_mode<synchronous>, transform_indices = @transform_8, window_bounds = array<i64: 32, 4>}, {pipeline_mode = #tpu.pipeline_mode<synchronous>, transform_indices = @transform_9, window_bounds = array<i64: 4, 32>}, {pipeline_mode = #tpu.pipeline_mode<synchronous>, transform_indices = @transform_10, window_bounds = array<i64: 32, 84>}, {pipeline_mode = #tpu.pipeline_mode<synchronous>, transform_indices = @transform_11, window_bounds = array<i64: 1, 84>}, {pipeline_mode = #tpu.pipeline_mode<synchronous>, transform_indices = @transform_12, window_bounds = array<i64: 42, 32>}, {pipeline_mode = #tpu.pipeline_mode<synchronous>, transform_indices = @transform_13, window_bounds = array<i64: 1, 32>}, {transform_indices = @transform_14, window_bounds = array<i64: 16, 32>}, {transform_indices = @transform_15, window_bounds = array<i64: 16, 128>}]} {
    %c0 = arith.constant 0 : index
    %c0_0 = arith.constant 0 : index
    %0 = vector.load %arg1[%c0, %c0_0] : memref<16x32xf32, #tpu.memory_space<vmem>>, vector<16x32xf32>
    %c0_1 = arith.constant 0 : index
    %c0_2 = arith.constant 0 : index
    %1 = vector.load %arg2[%c0_1, %c0_2] : memref<16x128xf32, #tpu.memory_space<vmem>>, vector<16x128xf32>
    %2 = vector.extract_strided_slice %1 {offsets = [0, 0], sizes = [16, 32], strides = [1, 1]} : vector<16x128xf32> to vector<16x32xf32>
    %3 = vector.extract_strided_slice %1 {offsets = [0, 32], sizes = [16, 32], strides = [1, 1]} : vector<16x128xf32> to vector<16x32xf32>
    %4 = vector.extract_strided_slice %1 {offsets = [0, 64], sizes = [16, 32], strides = [1, 1]} : vector<16x128xf32> to vector<16x32xf32>
    %5 = vector.extract_strided_slice %1 {offsets = [0, 96], sizes = [16, 32], strides = [1, 1]} : vector<16x128xf32> to vector<16x32xf32>
    %cst = arith.constant dense<0.000000e+00> : vector<16xf32>
    %6 = vector.multi_reduction <add>, %0, %cst [1] : vector<16x32xf32> to vector<16xf32>
    %7 = vector.shape_cast %6 : vector<16xf32> to vector<16x1xf32>
    %cst_3 = arith.constant 3.200000e+01 : f32
    %8 = vector.broadcast %cst_3 : f32 to vector<16x1xf32>
    %9 = arith.divf %7, %8 : vector<16x1xf32>
    %10 = vector.broadcast %9 : vector<16x1xf32> to vector<16x32xf32>
    %11 = arith.subf %0, %10 : vector<16x32xf32>
    %12 = arith.mulf %11, %11 : vector<16x32xf32>
    %cst_4 = arith.constant dense<0.000000e+00> : vector<16xf32>
    %13 = vector.multi_reduction <add>, %12, %cst_4 [1] : vector<16x32xf32> to vector<16xf32>
    %14 = vector.shape_cast %13 : vector<16xf32> to vector<16x1xf32>
    %cst_5 = arith.constant 3.200000e+01 : f32
    %15 = vector.broadcast %cst_5 : f32 to vector<16x1xf32>
    %16 = arith.divf %14, %15 : vector<16x1xf32>
    %17 = vector.broadcast %9 : vector<16x1xf32> to vector<16x32xf32>
    %18 = arith.subf %0, %17 : vector<16x32xf32>
    %cst_6 = arith.constant 9.99999974E-6 : f32
    %19 = vector.broadcast %cst_6 : f32 to vector<16x1xf32>
    %20 = arith.addf %16, %19 : vector<16x1xf32>
    %21 = math.rsqrt %20 : vector<16x1xf32>
    %22 = vector.broadcast %21 : vector<16x1xf32> to vector<16x32xf32>
    %23 = arith.mulf %18, %22 : vector<16x32xf32>
    %c0_7 = arith.constant 0 : index
    %c0_8 = arith.constant 0 : index
    %24 = vector.load %arg3[%c0_7, %c0_8] : memref<1x32xf32, #tpu.memory_space<vmem>>, vector<1x32xf32>
    %25 = vector.broadcast %24 : vector<1x32xf32> to vector<16x32xf32>
    %26 = arith.mulf %23, %25 : vector<16x32xf32>
    %c0_9 = arith.constant 0 : index
    %c0_10 = arith.constant 0 : index
    %27 = vector.load %arg4[%c0_9, %c0_10] : memref<1x32xf32, #tpu.memory_space<vmem>>, vector<1x32xf32>
    %28 = vector.broadcast %27 : vector<1x32xf32> to vector<16x32xf32>
    %29 = arith.addf %26, %28 : vector<16x32xf32>
    %30 = tpu.concatenate %29, %4 in 1 : vector<16x32xf32>, vector<16x32xf32> -> vector<16x64xf32>
    %31 = arith.truncf %30 : vector<16x64xf32> to vector<16x64xbf16>
    %c0_11 = arith.constant 0 : index
    %c0_12 = arith.constant 0 : index
    %32 = vector.load %arg5[%c0_11, %c0_12] : memref<64x128xbf16, #tpu.memory_space<vmem>>, vector<64x128xbf16>
    %cst_13 = arith.constant dense<0.000000e+00> : vector<16x128xf32>
    %33 = tpu.matmul %31, %32, %cst_13 {dimension_numbers = #tpu.dot_dimension_numbers<[1], [0], [0], [1], [0, 0, 1, 1], [], []>} : vector<16x64xbf16>, vector<64x128xbf16>, vector<16x128xf32> -> vector<16x128xf32>
    %c0_14 = arith.constant 0 : index
    %c0_15 = arith.constant 0 : index
    %34 = vector.load %arg6[%c0_14, %c0_15] : memref<1x128xf32, #tpu.memory_space<vmem>>, vector<1x128xf32>
    %35 = vector.broadcast %34 : vector<1x128xf32> to vector<16x128xf32>
    %36 = arith.addf %33, %35 : vector<16x128xf32>
    %37 = vector.extract_strided_slice %36 {offsets = [0, 0], sizes = [16, 32], strides = [1, 1]} : vector<16x128xf32> to vector<16x32xf32>
    %38 = vector.extract_strided_slice %36 {offsets = [0, 32], sizes = [16, 32], strides = [1, 1]} : vector<16x128xf32> to vector<16x32xf32>
    %39 = vector.extract_strided_slice %36 {offsets = [0, 64], sizes = [16, 32], strides = [1, 1]} : vector<16x128xf32> to vector<16x32xf32>
    %40 = vector.extract_strided_slice %36 {offsets = [0, 96], sizes = [16, 32], strides = [1, 1]} : vector<16x128xf32> to vector<16x32xf32>
    %41 = arith.addf %38, %5 : vector<16x32xf32>
    %42 = arith.maximumf %41, %37 : vector<16x32xf32>
    %43 = arith.subf %37, %42 : vector<16x32xf32>
    %44 = math.exp %43 : vector<16x32xf32>
    %45 = arith.subf %38, %42 : vector<16x32xf32>
    %46 = arith.addf %45, %5 : vector<16x32xf32>
    %47 = math.exp %46 : vector<16x32xf32>
    %48 = math.tanh %39 : vector<16x32xf32>
    %49 = arith.negf %40 : vector<16x32xf32>
    %50 = math.exp %49 : vector<16x32xf32>
    %cst_16 = arith.constant 1.000000e+00 : f32
    %51 = vector.broadcast %cst_16 : f32 to vector<16x32xf32>
    %52 = arith.addf %51, %50 : vector<16x32xf32>
    %53 = arith.divf %51, %52 : vector<16x32xf32>
    %54 = arith.mulf %47, %2 : vector<16x32xf32>
    %55 = arith.mulf %44, %48 : vector<16x32xf32>
    %56 = arith.addf %54, %55 : vector<16x32xf32>
    %57 = arith.mulf %47, %3 : vector<16x32xf32>
    %58 = arith.addf %57, %44 : vector<16x32xf32>
    %59 = tpu.reciprocal %58 {approx = true} : vector<16x32xf32> -> vector<16x32xf32>
    %60 = arith.mulf %56, %59 : vector<16x32xf32>
    %61 = arith.mulf %53, %60 : vector<16x32xf32>
    %c0_17 = arith.constant 0 : index
    %c0_18 = arith.constant 0 : index
    %62 = vector.load %arg9[%c0_17, %c0_18] : memref<32x4xf32, #tpu.memory_space<vmem>>, vector<32x4xf32>
    %c0_19 = arith.constant 0 : index
    %c0_20 = arith.constant 0 : index
    %63 = vector.load %arg10[%c0_19, %c0_20] : memref<4x32xf32, #tpu.memory_space<vmem>>, vector<4x32xf32>
    %cst_21 = arith.constant dense<0.000000e+00> : vector<16x4xf32>
    %64 = tpu.matmul %61, %62, %cst_21 {dimension_numbers = #tpu.dot_dimension_numbers<[1], [0], [0], [1], [0, 0, 1, 1], [], []>} : vector<16x32xf32>, vector<32x4xf32>, vector<16x4xf32> -> vector<16x4xf32>
    %cst_22 = arith.constant 1.250000e-01 : f32
    %65 = vector.broadcast %cst_22 : f32 to vector<16x4xf32>
    %66 = arith.mulf %64, %65 : vector<16x4xf32>
    %cst_23 = arith.constant dense<0.000000e+00> : vector<16x32xf32>
    %67 = tpu.matmul %66, %63, %cst_23 {dimension_numbers = #tpu.dot_dimension_numbers<[1], [0], [0], [1], [0, 0, 1, 1], [], []>} : vector<16x4xf32>, vector<4x32xf32>, vector<16x32xf32> -> vector<16x32xf32>
    %68 = arith.subf %61, %67 : vector<16x32xf32>
    %69 = arith.mulf %68, %68 : vector<16x32xf32>
    %cst_24 = arith.constant dense<0.000000e+00> : vector<16x4xf32>
    %70 = tpu.matmul %69, %62, %cst_24 {dimension_numbers = #tpu.dot_dimension_numbers<[1], [0], [0], [1], [0, 0, 1, 1], [], []>} : vector<16x32xf32>, vector<32x4xf32>, vector<16x4xf32> -> vector<16x4xf32>
    %cst_25 = arith.constant 1.250000e-01 : f32
    %71 = vector.broadcast %cst_25 : f32 to vector<16x4xf32>
    %72 = arith.mulf %70, %71 : vector<16x4xf32>
    %cst_26 = arith.constant dense<0.000000e+00> : vector<16x32xf32>
    %73 = tpu.matmul %72, %63, %cst_26 {dimension_numbers = #tpu.dot_dimension_numbers<[1], [0], [0], [1], [0, 0, 1, 1], [], []>} : vector<16x4xf32>, vector<4x32xf32>, vector<16x32xf32> -> vector<16x32xf32>
    %cst_27 = arith.constant 9.99999974E-6 : f32
    %74 = vector.broadcast %cst_27 : f32 to vector<16x32xf32>
    %75 = arith.addf %73, %74 : vector<16x32xf32>
    %76 = math.rsqrt %75 : vector<16x32xf32>
    %77 = arith.mulf %68, %76 : vector<16x32xf32>
    %c0_28 = arith.constant 0 : index
    %c0_29 = arith.constant 0 : index
    %78 = vector.load %arg7[%c0_28, %c0_29] : memref<1x32xf32, #tpu.memory_space<vmem>>, vector<1x32xf32>
    %79 = vector.broadcast %78 : vector<1x32xf32> to vector<16x32xf32>
    %80 = arith.mulf %77, %79 : vector<16x32xf32>
    %c0_30 = arith.constant 0 : index
    %c0_31 = arith.constant 0 : index
    %81 = vector.load %arg8[%c0_30, %c0_31] : memref<1x32xf32, #tpu.memory_space<vmem>>, vector<1x32xf32>
    %82 = vector.broadcast %81 : vector<1x32xf32> to vector<16x32xf32>
    %83 = arith.addf %80, %82 : vector<16x32xf32>
    %84 = arith.truncf %83 : vector<16x32xf32> to vector<16x32xbf16>
    %c0_32 = arith.constant 0 : index
    %c0_33 = arith.constant 0 : index
    %85 = vector.load %arg11[%c0_32, %c0_33] : memref<32x84xbf16, #tpu.memory_space<vmem>>, vector<32x84xbf16>
    %cst_34 = arith.constant dense<0.000000e+00> : vector<16x84xf32>
    %86 = tpu.matmul %84, %85, %cst_34 {dimension_numbers = #tpu.dot_dimension_numbers<[1], [0], [0], [1], [0, 0, 1, 1], [], []>} : vector<16x32xbf16>, vector<32x84xbf16>, vector<16x84xf32> -> vector<16x84xf32>
    %c0_35 = arith.constant 0 : index
    %c0_36 = arith.constant 0 : index
    %87 = vector.load %arg12[%c0_35, %c0_36] : memref<1x84xf32, #tpu.memory_space<vmem>>, vector<1x84xf32>
    %88 = vector.broadcast %87 : vector<1x84xf32> to vector<16x84xf32>
    %89 = arith.addf %86, %88 : vector<16x84xf32>
    %90 = vector.extract_strided_slice %89 {offsets = [0, 0], sizes = [16, 42], strides = [1, 1]} : vector<16x84xf32> to vector<16x42xf32>
    %91 = vector.extract_strided_slice %89 {offsets = [0, 42], sizes = [16, 42], strides = [1, 1]} : vector<16x84xf32> to vector<16x42xf32>
    %92 = arith.mulf %91, %91 : vector<16x42xf32>
    %93 = arith.mulf %91, %92 : vector<16x42xf32>
    %cst_37 = arith.constant 4.471500e-02 : f32
    %94 = vector.broadcast %cst_37 : f32 to vector<16x42xf32>
    %95 = arith.mulf %94, %93 : vector<16x42xf32>
    %96 = arith.addf %91, %95 : vector<16x42xf32>
    %cst_38 = arith.constant 0.797884583 : f32
    %97 = vector.broadcast %cst_38 : f32 to vector<16x42xf32>
    %98 = arith.mulf %97, %96 : vector<16x42xf32>
    %99 = math.tanh %98 : vector<16x42xf32>
    %cst_39 = arith.constant 1.000000e+00 : f32
    %100 = vector.broadcast %cst_39 : f32 to vector<16x42xf32>
    %101 = arith.addf %100, %99 : vector<16x42xf32>
    %cst_40 = arith.constant 5.000000e-01 : f32
    %102 = vector.broadcast %cst_40 : f32 to vector<16x42xf32>
    %103 = arith.mulf %102, %101 : vector<16x42xf32>
    %104 = arith.mulf %91, %103 : vector<16x42xf32>
    %105 = arith.addf %90, %104 : vector<16x42xf32>
    %106 = arith.truncf %105 : vector<16x42xf32> to vector<16x42xbf16>
    %c0_41 = arith.constant 0 : index
    %c0_42 = arith.constant 0 : index
    %107 = vector.load %arg13[%c0_41, %c0_42] : memref<42x32xbf16, #tpu.memory_space<vmem>>, vector<42x32xbf16>
    %cst_43 = arith.constant dense<0.000000e+00> : vector<16x32xf32>
    %108 = tpu.matmul %106, %107, %cst_43 {dimension_numbers = #tpu.dot_dimension_numbers<[1], [0], [0], [1], [0, 0, 1, 1], [], []>} : vector<16x42xbf16>, vector<42x32xbf16>, vector<16x32xf32> -> vector<16x32xf32>
    %c0_44 = arith.constant 0 : index
    %c0_45 = arith.constant 0 : index
    %109 = vector.load %arg14[%c0_44, %c0_45] : memref<1x32xf32, #tpu.memory_space<vmem>>, vector<1x32xf32>
    %110 = vector.broadcast %109 : vector<1x32xf32> to vector<16x32xf32>
    %111 = arith.addf %108, %110 : vector<16x32xf32>
    %112 = arith.addf %111, %0 : vector<16x32xf32>
    %c0_46 = arith.constant 0 : index
    %c0_47 = arith.constant 0 : index
    %113 = vector.load %arg15[%c0_46, %c0_47] : memref<16x32xf32, #tpu.memory_space<vmem>>, vector<16x32xf32>
    tpu.vector_store %arg15[%c0_46, %c0_47], %112 {strides = array<i32>} : memref<16x32xf32, #tpu.memory_space<vmem>>, vector<16x32xf32>,
    %114 = tpu.concatenate %56, %58, %61, %42 in 1 : vector<16x32xf32>, vector<16x32xf32>, vector<16x32xf32>, vector<16x32xf32> -> vector<16x128xf32>
    %c0_48 = arith.constant 0 : index
    %c0_49 = arith.constant 0 : index
    %115 = vector.load %arg16[%c0_48, %c0_49] : memref<16x128xf32, #tpu.memory_space<vmem>>, vector<16x128xf32>
    tpu.vector_store %arg16[%c0_48, %c0_49], %114 {strides = array<i32>} : memref<16x128xf32, #tpu.memory_space<vmem>>, vector<16x128xf32>,
    return
  }
  func.func @transform_0(%arg0: i32) -> (i32, i32) {
    %c0_i32 = arith.constant 0 : i32
    %c0_i32_0 = arith.constant 0 : i32
    return %arg0, %c0_i32 : i32, i32
  }
  func.func @transform_1(%arg0: i32) -> (i32, i32) {
    %c0_i32 = arith.constant 0 : i32
    %c0_i32_0 = arith.constant 0 : i32
    return %arg0, %c0_i32 : i32, i32
  }
  func.func @transform_2(%arg0: i32) -> (i32, i32) {
    %c0_i32 = arith.constant 0 : i32
    %c0_i32_0 = arith.constant 0 : i32
    %c0_i32_1 = arith.constant 0 : i32
    return %c0_i32, %c0_i32_0 : i32, i32
  }
  func.func @transform_3(%arg0: i32) -> (i32, i32) {
    %c0_i32 = arith.constant 0 : i32
    %c0_i32_0 = arith.constant 0 : i32
    %c0_i32_1 = arith.constant 0 : i32
    return %c0_i32, %c0_i32_0 : i32, i32
  }
  func.func @transform_4(%arg0: i32) -> (i32, i32) {
    %c0_i32 = arith.constant 0 : i32
    %c0_i32_0 = arith.constant 0 : i32
    %c0_i32_1 = arith.constant 0 : i32
    return %c0_i32, %c0_i32_0 : i32, i32
  }
  func.func @transform_5(%arg0: i32) -> (i32, i32) {
    %c0_i32 = arith.constant 0 : i32
    %c0_i32_0 = arith.constant 0 : i32
    %c0_i32_1 = arith.constant 0 : i32
    return %c0_i32, %c0_i32_0 : i32, i32
  }
  func.func @transform_6(%arg0: i32) -> (i32, i32) {
    %c0_i32 = arith.constant 0 : i32
    %c0_i32_0 = arith.constant 0 : i32
    %c0_i32_1 = arith.constant 0 : i32
    return %c0_i32, %c0_i32_0 : i32, i32
  }
  func.func @transform_7(%arg0: i32) -> (i32, i32) {
    %c0_i32 = arith.constant 0 : i32
    %c0_i32_0 = arith.constant 0 : i32
    %c0_i32_1 = arith.constant 0 : i32
    return %c0_i32, %c0_i32_0 : i32, i32
  }
  func.func @transform_8(%arg0: i32) -> (i32, i32) {
    %c0_i32 = arith.constant 0 : i32
    %c0_i32_0 = arith.constant 0 : i32
    %c0_i32_1 = arith.constant 0 : i32
    return %c0_i32, %c0_i32_0 : i32, i32
  }
  func.func @transform_9(%arg0: i32) -> (i32, i32) {
    %c0_i32 = arith.constant 0 : i32
    %c0_i32_0 = arith.constant 0 : i32
    %c0_i32_1 = arith.constant 0 : i32
    return %c0_i32, %c0_i32_0 : i32, i32
  }
  func.func @transform_10(%arg0: i32) -> (i32, i32) {
    %c0_i32 = arith.constant 0 : i32
    %c0_i32_0 = arith.constant 0 : i32
    %c0_i32_1 = arith.constant 0 : i32
    return %c0_i32, %c0_i32_0 : i32, i32
  }
  func.func @transform_11(%arg0: i32) -> (i32, i32) {
    %c0_i32 = arith.constant 0 : i32
    %c0_i32_0 = arith.constant 0 : i32
    %c0_i32_1 = arith.constant 0 : i32
    return %c0_i32, %c0_i32_0 : i32, i32
  }
  func.func @transform_12(%arg0: i32) -> (i32, i32) {
    %c0_i32 = arith.constant 0 : i32
    %c0_i32_0 = arith.constant 0 : i32
    %c0_i32_1 = arith.constant 0 : i32
    return %c0_i32, %c0_i32_0 : i32, i32
  }
  func.func @transform_13(%arg0: i32) -> (i32, i32) {
    %c0_i32 = arith.constant 0 : i32
    %c0_i32_0 = arith.constant 0 : i32
    %c0_i32_1 = arith.constant 0 : i32
    return %c0_i32, %c0_i32_0 : i32, i32
  }
  func.func @transform_14(%arg0: i32) -> (i32, i32) {
    %c0_i32 = arith.constant 0 : i32
    %c0_i32_0 = arith.constant 0 : i32
    return %arg0, %c0_i32 : i32, i32
  }
  func.func @transform_15(%arg0: i32) -> (i32, i32) {
    %c0_i32 = arith.constant 0 : i32
    %c0_i32_0 = arith.constant 0 : i32
    return %arg0, %c0_i32 : i32, i32
  }
}

</mosaic_0001>

<bundles_post_ra>
// kernel: tpu_custom_call.1
= control target key start
LH: loop header
LB: loop body
LE: loop exit
PB: predicated region body
PF: predicated region fallthrough
CT: control target
= control target key end

     0   :  { %s2087_s0 = inlined_call_operand.vmem [shape: f32[32,32], index: 0, kind: input, shape index: {}]   ;;  %s2088_s1 = inlined_call_operand.hbm [shape: f32[32,128], index: 1, kind: input, shape index: {}, may-alias: {1,15}]   ;;  %s2089_s2 = inlined_call_operand.vmem [shape: f32[1,32], index: 2, kind: input, shape index: {}]   ;;  %s2090_s3 = inlined_call_operand.vmem [shape: f32[1,32], index: 3, kind: input, shape index: {}]   ;;  %s2091_s4 = inlined_call_operand.vmem [shape: bf16[64,128], index: 4, kind: input, shape index: {}]   ;;  %s2092_s5 = inlined_call_operand.vmem [shape: f32[1,128], index: 5, kind: input, shape index: {}]   ;;  %s2093_s6 = inlined_call_operand.vmem [shape: f32[1,32], index: 6, kind: input, shape index: {}]   ;;  %s2094_s7 = inlined_call_operand.vmem [shape: f32[1,32], index: 7, kind: input, shape index: {}]   ;;  %s2095_s8 = inlined_call_operand.vmem [shape: f32[32,4], index: 8, kind: input, shape index: {}]   ;;  %s2096_s9 = inlined_call_operand.vmem [shape: f32[4,32], index: 9, kind: input, shape index: {}]   ;;  %s2097_s10 = inlined_call_operand.vmem [shape: bf16[32,84], index: 10, kind: input, shape index: {}]   ;;  %s2098_s11 = inlined_call_operand.vmem [shape: f32[1,84], index: 11, kind: input, shape index: {}]   ;;  %s2099_s12 = inlined_call_operand.vmem [shape: bf16[42,32], index: 12, kind: input, shape index: {}]   ;;  %s2100_s13 = inlined_call_operand.vmem [shape: f32[1,32], index: 13, kind: input, shape index: {}]   ;;  %s2101_s14 = inlined_call_operand.hbm [shape: f32[32,32], index: 14, kind: output, shape index: {0}]   ;;  %s2102_s15 = inlined_call_operand.hbm [shape: f32[32,128], index: 15, kind: output, shape index: {1}, may-alias: {1,15}]  }
   0x1   :  { %2112 = sst [smem:[#allocation17_spill]] %s2087_s0 }
   0x2   :  { %2113 = sst [smem:[#allocation18_spill]] %s2088_s1 }
   0x3   :  { %2114 = sst [smem:[#allocation19_spill]] %s2089_s2 }
   0x4   :  { %2115 = sst [smem:[#allocation20_spill]] %s2100_s13 }
   0x5   :  { %2116 = sst [smem:[#allocation21_spill]] %s2101_s14 }
   0x6   :  { %2117 = sst [smem:[#allocation22_spill]] %s2102_s15 }
   0x7   :  { %21 = vsyncpa [#allocation3], 0 }
   0x8   :  { %23 = vsyncpa [#allocation3 + $0x1], 0 }
   0x9   :  { %24 = vsyncpa [#allocation4], 0 }
   0xa   :  { %26 = vsyncpa [#allocation4 + $0x1], 0 }
   0xb   :  { %27 = vsyncpa [#allocation7], 0 }
   0xc   :  { %29 = vsyncpa [#allocation7 + $0x1], 0  ;;  %s1735_s18 = smov 0   ;;  %s1737_s19 = smov 0  }
   0xd   :  { %s1739_s20 = smov 0   ;;  %s1741_s21 = smov 0  }
   0xe LB: > { %2118 = sst [smem:[#allocation11_spill]] %s1632_s18  ;;  %s1756_s22 = sadd.s32 4294967295, %s1644_s21   ;;  %s1644_s21 = sphi %s1741_s21, %s2140_s21   ;;  %s1640_s20 = sphi %s1739_s20, %s2142_s20   ;;  %s1636_s19 = sphi %s1737_s19, %s2144_s19   ;;  %s1632_s18 = sphi %s1735_s18, %s2143_s18  }
   0xf   : > { %2119 = sst [smem:[#allocation12_spill]] %s1640_s20  ;;  %s1323_s23 = sadd.s32 4294967294, %s1644_s21  }
  0x10   : > { %s1760_s24 = sadd.s32 1, %s1644_s21   ;;  %s68_s25 = sadd.s32 1, %s1640_s20 }
  0x11   : > { %2120 = sst [smem:[#allocation13_spill]] %s1760_s24  ;;  %s65_s26 = ssub.s32 %s1644_s21, %s1760_s24 }
  0x12   : > { %p75_p0 = scmp.ne.s32.totalorder %s1640_s20, %s1636_s19  ;;  %p66_p1 = scmp.eq.s32.totalorder %s65_s26, 0 }
  0x13   : > { %p76_p2 = scmp.eq.s32.totalorder %s1644_s21, 0  ;;  %p81_p3 = scmp.ne.s32.totalorder %s1636_s19, %s1632_s18 }
  0x14   : > { %p82_p4 = scmp.eq.s32.totalorder %s1756_s22, 0  ;;  %p357_p7 = scmp.eq.s32.totalorder %s1756_s22, 1 }
  0x15   : > { %s1772_s27 = scalar_select %p66_p1, %s1640_s20, %s68_s25  }
  0x16   : > { %p1774_p5 = por %p76_p2, %p75_p0  ;;  %p1778_p6 = por %p82_p4, %p81_p3 }
  0x17   : > { %2121 = sst [smem:[#allocation14_spill]] %s1772_s27  ;;  %p363_p8 = scmp.eq.s32.totalorder %s1323_s23, 1 }
  0x18   : > { %p1423_p10 = scmp.lt.s32.totalorder %s1644_s21, 2  ;;  %p1785_p11 = por %p357_p7, %p75_p0 }
  0x19   : > { %p1789_p12 = por %p363_p8, %p81_p3  ;;  %s454_s17 = sand.u32 1, %s1640_s20  }
  0x1a   : > { %s2124_s30 = scalar_select %p1785_p11, 1, 0 }
  0x1b   : > { %s2126_s16 = scalar_select %p1789_p12, 1, 0 }
  0x1c   : > { %2125 = sst [smem:[#allocation15_spill]] %s2124_s30  ;;  %s1394_s25 = sshll.u32 %s1644_s21, 4 }
  0x1d   : > { %2127 = sst [smem:[#allocation16_spill]] %s2126_s16  ;;  %s1326_s26 = sshll.u32 %s454_s17, 4 }
  0x1e   : > { %s2128_s1 = sld [smem:[#allocation18_spill]]  ;;  %s458_s23 = scalar_lea.vmem [#allocation2], %s1326_s26 }
  0x1f   : > { %s466_s13 = sshll.u32 %s458_s23, 4  ;;  %p1800_p13 = pnand %p1423_p10, %p1774_p5  ;;  %s467_s13 = int_to_ptr.vmem [resolvable:$true] %s466_s13 }
  0x20   : > { %p1329_p0 = scmp.ge.s32.totalorder %s1644_s21, 1  ;;  %p474_p1 = scmp.lt.s32.totalorder %s1644_s21, 3 }
  0x21   : > { %s455_s20 = scalar_lea.sflag [#allocation3], %s454_s17  ;;  %p1520_p3 = pneg %p1800_p13 }
  0x24   : > { %s463_s18 = scalar_lea.hbm %s2128_s1, %s1394_s25  ;;  %s1523_s27 = scalar_lea.hbm %s2128_s1, 32 }
  0x25   : > { %s464_s14 = sshll.u32 %s463_s18, 4  ;;  %s465_s14 = int_to_ptr.hbm [resolvable:$true] %s464_s14 }
  0x26   : > { %s1516_s16 = sshra.s32 %s465_s14, 4  ;;  %s1517_s16 = int_to_ptr.hbm [resolvable:$true] %s1516_s16 }
  0x27   : > { %s1518_s30 = scalar_lea.hbm %s1517_s16, 16  ;;  %p1524_p5 = scmp.lt.s32.totalorder %s1517_s16, %s2128_s1 }
  0x28   : > { %p1519_p2 = scmp.ne.s32.totalorder %s1517_s16, %s1518_s30  ;;  %p1525_p8 = scmp.lt.s32.totalorder %s1523_s27, %s1518_s30 }
  0x2a   : > { %p1521_p4 = pnand %p1520_p3, %p1519_p2  ;;  %p1526_p10 = por %p1525_p8, %p1524_p5 }
  0x2c   : > { %p1522_p7 = pneg %p1521_p4 }
  0x2e   : > { %p1527_p9 = pnand %p1526_p10, %p1522_p7 }
  0x30   : > { %1530 = shalt.err (!%p1527_p9)
}
  0x31   : > { %s1646_s17 = smov 128   ;;  %s1647_s26 = smov 8  }
  0x32   : > { %1415 = dma.hbm_to_vmem [thread:$0]  (!%p1800_p13), %s465_s14, 256, %s467_s13, %s455_s20, %s1646_s17, %s1646_s17, %s1647_s26  }
  0x33   : > { %p475_p2 = pnand %p1329_p0, %p474_p1 }
  0x34   : > { %s1821_s23 = sand.u32 (!%p475_p2), 1, %s1636_s19  }
  0x35   : > { %478 = sbr.rel (%p475_p2) target bundleno = 2470 (0x9a6), region = 76  ;;  %s1824_s30 = sshll.u32 (!%p475_p2), %s1821_s23, 4 }
  0x36   : > { %s481_s16 = scalar_lea.sflag (!%p475_p2), [#allocation3], %s1821_s23  ;;  %s484_s18 = scalar_lea.vmem (!%p475_p2), [#allocation2], %s1824_s30 }
  0x3a   : > { %1619 = dma.done.wait (%p1778_p6), %s481_s16, 256  }
  0x3b   : > { %1621 = vsyncadd (%p1778_p6), %s481_s16, 4294967040  ;;  %s1333_s13 = sshll.u32 %s1756_s22, 1  ;;  %vm556_vm0 = vcmask 261120   ;;  %s2130_s0 = sld [smem:[#allocation17_spill]]  ;;  %v1648_v4 = vmov 32.0   ;;  %v1844_v7 = vld [vmem:[%s484_s18] sm:$0xff] }
  0x3c   : > { %p543_p9 = scmp.lt.s32.totalorder %s1333_s13, 3  ;;  %1478 = vrcp.f32 %v1648_v4  ;;  %v1846_v8 = vld [vmem:[%s484_s18 + $0x8] sm:$0xff]  ;;  %s1649_s29 = smov 96   ;;  %v1397_v25 = vld [vmem:[%s2091_s4 + $0x10] sm:$0xff]  ;;  %v1395_v29 = vld [vmem:[%s2091_s4] sm:$0xff]  ;;  %vm667_vm8 = vcmask 523264  }
  0x3d   : > { %v1466_v9 = vpack.i.bf16 %v1846_v8, %v1844_v7  ;;  %s1650_s27 = smov 64   ;;  %v1398_v24 = vld [vmem:[%s2091_s4 + $0x18] sm:$0xff]  ;;  %v1396_v26 = vld [vmem:[%s2091_s4 + $0x8] sm:$0xff]  ;;  %s2131_s2 = sld [smem:[#allocation19_spill]]  ;;  %v1472_v50 = vld [vmem:[%s2090_s3] ss:$0 sm:$0xff] }
  0x3e   : > { %s2146_s13 = smov (!%p543_p9, %s1333_s13), 3  ;;  %675 = vmatpush.bf16.msra.mxu0 %v1398_v24  ;;  %v1473_v62 = vld [vmem:[%s2092_s5] ss:$0 sm:$0xff]  ;;  %s1651_s26 = smov 32  }
  0x3f   : > { %s1334_s14 = sshll.u32 %s2146_s13, 3  ;;  %1467 = vrot.lane.b32.xlu2 %v1466_v9, %s1649_s29  ;;  %s1404_s25 = sshll.u32 %s1756_s22, 4 }
  0x40   : > { %s2133_s18 = sld [smem:[#allocation22_spill]] }
  0x41   : > { %s546_s24 = scalar_lea.vmem %s2130_s0, %s1334_s14 }
  0x42   : > { %v1836_v0 = vld [vmem:[%s546_s24] sm:$0xff]  ;;  %v1840_v2 = vld [vmem:[%s546_s24 + $0x8] sm:$0xff]  ;;  %v1479_v5 = vpop.eup %1478  ;;  %676 = vmatpush.bf16.msra.mxu0 %v1397_v25 }
  0x43   : > { %v557_v1 = vsel %vm556_vm0, %v1836_v0, 0.0  ;;  %v560_v3 = vsel %vm556_vm0, %v1840_v2, 0.0  ;;  %v564_v6 = vmul.f32 32.0, %v1479_v5  ;;  %vm568_vm1 = vweird.f32 %v1479_v5  ;;  %v1471_v46 = vld [vmem:[%s2131_s2] ss:$0 sm:$0xff] }
  0x44   : > { %558 = vadd.xlane.f32.xlu0 %v557_v1 }
  0x45   : > { %v565_v10 = vsub.f32 1.0, %v564_v6 }
  0x46   : > { %677 = vmatpush.bf16.msra.mxu0 %v1396_v26  ;;  %s2134_s13 = smov %s2133_s18  ;;  %s1201_s14 = scalar_lea.hbm %s2133_s18, %s1404_s25 }
  0x47   : > { %v566_v11 = vmul.f32 %v1479_v5, %v565_v10  ;;  %685 = vrot.lane.b32.xlu2 %v1844_v7, %s1650_s27  ;;  %s1204_s15 = sshll.u32 %s1201_s14, 4  ;;  %s1566_s22 = scalar_lea.hbm %s2134_s13, 32  ;;  %s1205_s15 = int_to_ptr.hbm [resolvable:$true] %s1204_s15 }
  0x48   : > { %s1560_s20 = sshra.s32 %s1205_s15, 4  ;;  %s1561_s20 = int_to_ptr.hbm [resolvable:$true] %s1560_s20 }
  0x49   : > { %v567_v12 = vadd.f32 %v1479_v5, %v566_v11  ;;  %s1562_s24 = scalar_lea.hbm %s1561_s20, 16  ;;  %p1567_p1 = scmp.lt.s32.totalorder %s1561_s20, %s2134_s13 }
  0x4a   : > { %678 = vmatpush.bf16.msra.mxu0 %v1395_v29  ;;  %p1563_p6 = scmp.ne.s32.totalorder %s1561_s20, %s1562_s24  ;;  %p1568_p3 = scmp.lt.s32.totalorder %s1566_s22, %s1562_s24 }
  0x4b   : > { %v569_v13 = vsel %vm568_vm1, %v1479_v5, %v567_v12 }
  0x4c   : > { %561 = vadd.xlane.f32.xlu0 %v560_v3  ;;  %p1564_p13 = pnand %p1563_p6, %p1785_p11  ;;  %p1569_p4 = por %p1568_p3, %p1567_p1 }
  0x4e   : > { %p1565_p0 = pneg %p1564_p13 }
  0x50   : > { %p1570_p7 = pnand %p1569_p4, %p1565_p0 }
  0x99   : > { %v1468_v52 = vpop.permute.xlu2 %1467 }
  0x9a   : > { %v1470_v54 = vunpack.i.h.bf16 %v1468_v52  ;;  %v1469_v55 = vunpack.i.l.bf16 %v1468_v52 }
  0xa1   : > { %v686_v6 = vpop.permute.xlu2 %685 }
  0xb7   : > { %v559_v14 = vpop.xlane.xlu0 %558 }
  0xb8   : > { %v570_v15 = vmul.f32 %v569_v13, %v559_v14 }
  0xba   : > { %v572_v16 = vsub.f32 %v1836_v0, %v570_v15 }
  0xbc   : > { %v574_v17 = vmul.f32 %v572_v16, %v572_v16 }
  0xbe   : > { %v576_v18 = vsel %vm556_vm0, %v574_v17, 0.0 }
  0xbf   : > { %577 = vadd.xlane.f32.xlu1 %v576_v18  ;;  %v562_v19 = vpop.xlane.xlu0 %561 }
  0xc0   : > { %v571_v20 = vmul.f32 %v569_v13, %v562_v19 }
  0xc2   : > { %v573_v21 = vsub.f32 %v1840_v2, %v571_v20 }
  0xc4   : > { %v575_v22 = vmul.f32 %v573_v21, %v573_v21 }
  0xc6   : > { %v579_v23 = vsel %vm556_vm0, %v575_v22, 0.0 }
  0xc7   : > { %580 = vadd.xlane.f32.xlu1 %v579_v23 }
  0xe0   : > { %687 = vrot.lane.b32.xlu1 %v1846_v8, %s1650_s27 }
 0x132   : > { %v578_v27 = vpop.xlane.xlu1 %577 }
 0x133   : > { %v582_v28 = vmul.f32 %v578_v27, %v569_v13 }
 0x135   : > { %v584_v30 = vadd.f32 1e-05, %v582_v28 }
 0x137   : > { %1480 = vrsqrt.f32 %v584_v30  ;;  %vm592_vm3 = vweird.f32 %v584_v30 }
 0x13a   : > { %v581_v31 = vpop.xlane.xlu1 %580 }
 0x13b   : > { %v583_v32 = vmul.f32 %v581_v31, %v569_v13 }
 0x13d   : > { %v1481_v33 = vpop.eup %1480  ;;  %v585_v34 = vadd.f32 1e-05, %v583_v32 }
 0x13e   : > { %v587_v35 = vmul.f32 %v1481_v33, %v584_v30  ;;  %vm593_vm2 = vweird.f32 %v1481_v33 }
 0x13f   : > { %1482 = vrsqrt.f32 %v585_v34  ;;  %vm594_vm4 = vmor %vm592_vm3, %vm593_vm2  ;;  %vm602_vm6 = vweird.f32 %v585_v34  ;;  %vm866_vm2 = vcmask 1043456   ;;  %vm859_vm3 = vcmask 31744  }
 0x140   : > { %v588_v36 = vmul.f32 %v1481_v33, %v587_v35 }
 0x142   : > { %v589_v37 = vmul.f32 0.5, %v588_v36 }
 0x144   : > { %v590_v38 = vsub.f32 1.5, %v589_v37 }
 0x145   : > { %v1483_v39 = vpop.eup %1482 }
 0x146   : > { %v591_v40 = vmul.f32 %v1481_v33, %v590_v38  ;;  %v597_v41 = vmul.f32 %v1483_v39, %v585_v34  ;;  %vm603_vm5 = vweird.f32 %v1483_v39 }
 0x147   : > { %vm604_vm7 = vmor %vm602_vm6, %vm603_vm5 }
 0x148   : > { %v595_v42 = vsel %vm594_vm4, %v1481_v33, %v591_v40  ;;  %v598_v43 = vmul.f32 %v1483_v39, %v597_v41 }
 0x149   : > { %v606_v45 = vmul.f32 %v595_v42, %v572_v16 }
 0x14a   : > { %v599_v44 = vmul.f32 0.5, %v598_v43 }
 0x14b   : > { %v612_v49 = vmul.f32 %v1471_v46, %v606_v45 }
 0x14c   : > { %v600_v47 = vsub.f32 1.5, %v599_v44 }
 0x14d   : > { %v618_v57 = vadd.f32 %v1472_v50, %v612_v49 }
 0x14e   : > { %v601_v48 = vmul.f32 %v1483_v39, %v600_v47 }
 0x14f   : > { %v628_v59 = vsel %vm556_vm0, %v618_v57, %v1469_v55 }
 0x150   : > { %v605_v51 = vsel %vm604_vm7, %v1483_v39, %v601_v48 }
 0x151   : > { %v607_v53 = vmul.f32 %v605_v51, %v573_v21 }
 0x152   : > { %v688_v12 = vpop.permute.xlu1 %687 }
 0x153   : > { %v613_v56 = vmul.f32 %v1471_v46, %v607_v53 }
 0x155   : > { %v619_v58 = vadd.f32 %v1472_v50, %v613_v56 }
 0x157   : > { %v629_v60 = vsel %vm556_vm0, %v619_v58, %v1470_v54 }
 0x158   : > { %v630_v61 = vpack.c.bf16 %v629_v60, %v628_v59  ;;  %v822_v60 = vld [vmem:[%s2095_s8 + $0x18] sm:$0xff] }
 0x159   : > { %846 = vmatpush.msra.mxu1 %v822_v60  ;;  %927 = vmatpush.msra.mxu3 %v822_v60 }
 0x15a   : > { %1351 = vmatmul.msk.bf16.vlgmr.msra.gmra.mxu0 %vm667_vm8, %v630_v61  ;;  %v821_v61 = vld [vmem:[%s2095_s8 + $0x10] sm:$0xff] }
 0x15b   : > { %847 = vmatpush.msra.mxu1 %v821_v61  ;;  %928 = vmatpush.msra.mxu3 %v821_v61 }
 0x1d7   : > { %v680_v63 = vpop.f32.mrf.mxu0 }
 0x1d8   : > { %v1883_v1 = vadd.f32 %v1473_v62, %v680_v63  ;;  %v820_v63 = vld [vmem:[%s2095_s8 + $0x8] sm:$0xff] }
 0x1d9   : > { %848 = vmatpush.msra.mxu1 %v820_v63  ;;  %929 = vmatpush.msra.mxu3 %v820_v63 }
 0x1da   : > { %695 = vrot.lane.b32.xlu0 %v1883_v1, %s1651_s26  ;;  %1484 = vtanh.f32 %v1883_v1  ;;  %v691_v9 = vadd.f32 %v686_v6, %v1883_v1  ;;  %v1352_v53 = vmul.f32 -1.442695, %v1883_v1 }
 0x1df   : > { %v682_v3 = vpop.f32.mrf.mxu0 }
 0x1e0   : > { %v1485_v4 = vpop.eup %1484  ;;  %v1888_v5 = vadd.f32 %v1473_v62, %v682_v3 }
 0x1e2   : > { %697 = vrot.lane.b32.xlu2 %v1888_v5, %s1651_s26  ;;  %775 = vrot.lane.b32.xlu0 %v1485_v4, %s1650_s27  ;;  %v692_v14 = vadd.f32 %v688_v12, %v1888_v5  ;;  %1486 = vtanh.f32 %v1888_v5  ;;  %v1353_v54 = vmul.f32 -1.442695, %v1888_v5 }
 0x1e8   : > { %v1487_v16 = vpop.eup %1486 }
 0x1ea   : > { %765 = vrot.lane.b32.xlu0 %v1844_v7, %s1651_s26 }
 0x1f2   : > { %767 = vrot.lane.b32.xlu0 %v1846_v8, %s1651_s26 }
 0x23c   : > { %v698_v13 = vpop.permute.xlu2 %697 }
 0x23d   : > { %v1903_v15 = vmax.f32 %v692_v14, %v698_v13 }
 0x23f   : > { %v718_v31 = vsub.f32 %v1888_v5, %v1903_v15 }
 0x241   : > { %v720_v33 = vadd.f32 %v718_v31, %v688_v12  ;;  %v823_v31 = vld [vmem:[%s2096_s9] sm:$0xf] }
 0x242   : > { %1356 = vmatpush.msk.msra.mxu2 %vm866_vm2, %v823_v31 }
 0x243   : > { %v723_v34 = vmul.f32 1.442695, %v720_v33 }
 0x244   : > { %1361 = vmatpush.msk.msrb.mxu2 %vm866_vm2, %v823_v31 }
 0x24c   : > { %v696_v10 = vpop.permute.xlu0 %695 }
 0x24d   : > { %v1898_v11 = vmax.f32 %v691_v9, %v696_v10 }
 0x24f   : > { %705 = vrot.lane.b32.xlu2 %v1898_v11, %s1649_s29  ;;  %v717_v29 = vsub.f32 %v1883_v1, %v1898_v11 }
 0x251   : > { %v719_v30 = vadd.f32 %v717_v29, %v686_v6 }
 0x253   : > { %v721_v32 = vmul.f32 1.442695, %v719_v30 }
 0x254   : > { %v776_v23 = vpop.permute.xlu0 %775 }
 0x257   : > { %707 = vrot.lane.b32.xlu2 %v1903_v15, %s1649_s29 }
 0x25c   : > { %v766_v38 = vpop.permute.xlu0 %765 }
 0x25f   : > { %777 = vrot.lane.b32.xlu2 %v1487_v16, %s1650_s27 }
 0x2a9   : > { %v706_v17 = vpop.permute.xlu2 %705 }
 0x2aa   : > { %v711_v18 = vsub.f32 %v1883_v1, %v706_v17  ;;  %v819_v1 = vld [vmem:[%s2095_s8] sm:$0xff] }
 0x2ab   : > { %849 = vmatpush.msra.mxu1 %v819_v1  ;;  %930 = vmatpush.msra.mxu3 %v819_v1 }
 0x2ac   : > { %v713_v19 = vmul.f32 1.442695, %v711_v18 }
 0x2ae   : > { %1488 = vpow2.f32 %v713_v19 }
 0x2b1   : > { %v708_v20 = vpop.permute.xlu2 %707 }
 0x2b2   : > { %v712_v21 = vsub.f32 %v1888_v5, %v708_v20 }
 0x2b4   : > { %v1489_v22 = vpop.eup %1488  ;;  %v715_v24 = vmul.f32 1.442695, %v712_v21 }
 0x2b5   : > { %797 = vrot.lane.b32.xlu1 %v1489_v22, %s1651_s26  ;;  %v781_v25 = vmul.f32 %v1489_v22, %v776_v23 }
 0x2b6   : > { %1490 = vpow2.f32 %v715_v24 }
 0x2b7   : > { %785 = vrot.lane.b32.xlu2 %v781_v25, %s1651_s26  ;;  %1492 = vpow2.f32 %v721_v32 }
 0x2b8   : > { %1494 = vpow2.f32 %v723_v34 }
 0x2b9   : > { %v778_v27 = vpop.permute.xlu2 %777 }
 0x2bc   : > { %v1491_v26 = vpop.eup %1490 }
 0x2bd   : > { %v782_v28 = vmul.f32 %v1491_v26, %v778_v27  ;;  %799 = vrot.lane.b32.xlu1 %v1491_v26, %s1651_s26  ;;  %v1493_v35 = vpop.eup %1492 }
 0x2be   : > { %v793_v36 = vmul.f32 %v1493_v35, %v1844_v7  ;;  %v1495_v41 = vpop.eup %1494  ;;  %v771_v42 = vmul.f32 %v1493_v35, %v766_v38  ;;  %v768_v7 = vpop.permute.xlu0 %767 }
 0x2bf   : > { %787 = vrot.lane.b32.xlu2 %v782_v28, %s1651_s26  ;;  %v794_v43 = vmul.f32 %v1495_v41, %v1846_v8  ;;  %v772_v50 = vmul.f32 %v1495_v41, %v768_v7  ;;  %v1474_v7 = vld [vmem:[%s2093_s6] ss:$0 sm:$0xff] }
 0x311   : > { %v786_v40 = vpop.permute.xlu2 %785 }
 0x312   : > { %v1924_v44 = vadd.f32 %v786_v40, %v771_v42 }
 0x319   : > { %v788_v49 = vpop.permute.xlu2 %787 }
 0x31a   : > { %v1931_v51 = vadd.f32 %v788_v49, %v772_v50 }
 0x327   : > { %v798_v37 = vpop.permute.xlu1 %797 }
 0x328   : > { %v1920_v39 = vadd.f32 %v798_v37, %v793_v36 }
 0x32a   : > { %1496 = vrcp.f32 %v1920_v39 }
 0x32f   : > { %v800_v45 = vpop.permute.xlu1 %799 }
 0x330   : > { %v1497_v46 = vpop.eup %1496  ;;  %v1926_v47 = vadd.f32 %v800_v45, %v794_v43 }
 0x331   : > { %v807_v48 = vmul.f32 %v1497_v46, %v1924_v44 }
 0x332   : > { %1498 = vrcp.f32 %v1926_v47 }
 0x333   : > { %811 = vrot.lane.b32.xlu1 %v807_v48, %s1650_s27  ;;  %1500 = vpow2.f32 %v1352_v53 }
 0x334   : > { %1502 = vpow2.f32 %v1353_v54 }
 0x338   : > { %v1499_v52 = vpop.eup %1498 }
 0x339   : > { %v808_v8 = vmul.f32 %v1499_v52, %v1931_v51  ;;  %v1501_v55 = vpop.eup %1500 }
 0x33a   : > { %v733_v56 = vadd.f32 1.0, %v1501_v55  ;;  %v1503_v57 = vpop.eup %1502 }
 0x33b   : > { %813 = vrot.lane.b32.xlu0 %v808_v8, %s1650_s27  ;;  %v734_v58 = vadd.f32 1.0, %v1503_v57 }
 0x33c   : > { %1504 = vrcp.f32 %v733_v56  ;;  %v746_v12 = vand.u32 2147483648, %v733_v56  ;;  %vm740_vm10 = vweird.f32 %v733_v56  ;;  %v744_v13 = vand.u32 2147483647, %v733_v56 }
 0x33d   : > { %1506 = vrcp.f32 %v734_v58  ;;  %v761_v22 = vand.u32 2147483648, %v734_v58  ;;  %vm755_vm14 = vweird.f32 %v734_v58  ;;  %v759_v23 = vand.u32 2147483647, %v734_v58 }
 0x33e   : > { %v747_v17 = vor.u32 1.1754944e-38, %v746_v12  ;;  %vm745_vm12 = vcmp.eq.f32.partialorder %v744_v13, 8.507059e+37 }
 0x33f   : > { %v762_v25 = vor.u32 1.1754944e-38, %v761_v22  ;;  %vm760_vm1 = vcmp.eq.f32.partialorder %v759_v23, 8.507059e+37 }
 0x342   : > { %v1505_v59 = vpop.eup %1504 }
 0x343   : > { %v736_v62 = vmul.f32 %v1505_v59, %v733_v56  ;;  %v1507_v4 = vpop.eup %1506  ;;  %vm741_vm9 = vweird.f32 %v1505_v59 }
 0x344   : > { %v751_v6 = vmul.f32 %v1507_v4, %v734_v58  ;;  %vm742_vm11 = vmor %vm740_vm10, %vm741_vm9  ;;  %vm756_vm13 = vweird.f32 %v1507_v4 }
 0x345   : > { %v737_v3 = vsub.f32 1.0, %v736_v62  ;;  %vm757_vm15 = vmor %vm755_vm14, %vm756_vm13  ;;  %vm1162_vm13 = vcmask 785408  }
 0x346   : > { %v752_v10 = vsub.f32 1.0, %v751_v6 }
 0x347   : > { %v738_v5 = vmul.f32 %v1505_v59, %v737_v3 }
 0x348   : > { %v753_v16 = vmul.f32 %v1507_v4, %v752_v10 }
 0x349   : > { %v739_v9 = vadd.f32 %v1505_v59, %v738_v5 }
 0x34a   : > { %v754_v21 = vadd.f32 %v1507_v4, %v753_v16  ;;  %v1399_v16 = vld [vmem:[%s2097_s10] sm:$0xff] }
 0x34b   : > { %v743_v14 = vsel %vm742_vm11, %v1505_v59, %v739_v9  ;;  %v1475_v9 = vld [vmem:[%s2094_s7] ss:$0 sm:$0xff]  ;;  %vm1116_vm11 = vcmask 1044480  }
 0x34c   : > { %v748_v18 = vsel %vm745_vm12, %v747_v17, %v743_v14  ;;  %v758_v24 = vsel %vm757_vm15, %v1507_v4, %v754_v21  ;;  %v1400_v14 = vld [vmem:[%s2097_s10 + $0x8] sm:$0xff]  ;;  %vm1112_vm12 = vcmask 343040  }
 0x34d   : > { %v763_v26 = vsel %vm760_vm1, %v762_v25, %v758_v24  ;;  %1048 = vmatpush.bf16.msrb.mxu1 %v1400_v14 }
 0x351   : > { %1049 = vmatpush.bf16.msrb.mxu1 %v1399_v16 }
 0x3a5   : > { %v812_v19 = vpop.permute.xlu1 %811 }
 0x3a6   : > { %v1949_v20 = vmul.f32 %v812_v19, %v748_v18 }
 0x3a8   : > { %826 = vrot.lane.b32.xlu2 %v1949_v20, %s1651_s26 }
 0x3ad   : > { %v814_v27 = vpop.permute.xlu0 %813 }
 0x3ae   : > { %v1953_v28 = vmul.f32 %v814_v27, %v763_v26 }
 0x3b0   : > { %828 = vrot.lane.b32.xlu1 %v1953_v28, %s1651_s26 }
 0x402   : > { %v827_v29 = vpop.permute.xlu2 %826 }
 0x403   : > { %1354 = vmatmul.msk.f32.vlgmr.msra.gmra.mxu1 %vm556_vm0, %v827_v29 }
 0x422   : > { %v829_v30 = vpop.permute.xlu1 %828 }
 0x423   : > { %1355 = vmatmul.msk.f32.gmra.mxu1 %vm556_vm0, %v829_v30  ;;  %v1476_v30 = vld [vmem:[%s2098_s11] ss:$0 sm:$0xff] }
 0x480   : > { %v851_v32 = vpop.f32.mrf.mxu1 }
 0x481   : > { %v857_v33 = vmul.f32 0.125, %v851_v32 }
 0x483   : > { %1357 = vmatmul.msk.f32.vlgmr.msra.gmra.mxu2 %vm859_vm3, %v857_v33 }
 0x4a0   : > { %v854_v34 = vpop.f32.mrf.mxu1 }
 0x4a1   : > { %v858_v35 = vmul.f32 0.125, %v854_v34 }
 0x4a3   : > { %1358 = vmatmul.msk.f32.gmra.mxu2 %vm859_vm3, %v858_v35 }
 0x506   : > { %v887_v36 = vpop.f32.mrf.mxu2 }
 0x507   : > { %895 = vrot.lane.b32.xlu0 %v887_v36, %s1649_s29 }
 0x526   : > { %v890_v37 = vpop.f32.mrf.mxu2 }
 0x527   : > { %897 = vrot.lane.b32.xlu2 %v890_v37, %s1649_s29 }
 0x579   : > { %v896_v38 = vpop.permute.xlu0 %895 }
 0x57a   : > { %v901_v40 = vsub.f32 %v1949_v20, %v896_v38 }
 0x57c   : > { %v903_v41 = vmul.f32 %v901_v40, %v901_v40 }
 0x57e   : > { %907 = vrot.lane.b32.xlu1 %v903_v41, %s1651_s26 }
 0x581   : > { %v898_v42 = vpop.permute.xlu2 %897 }
 0x582   : > { %v902_v43 = vsub.f32 %v1953_v28, %v898_v42 }
 0x584   : > { %v904_v45 = vmul.f32 %v902_v43, %v902_v43 }
 0x586   : > { %909 = vrot.lane.b32.xlu0 %v904_v45, %s1651_s26 }
 0x58e   : > { %1002 = vrot.lane.b32.xlu0 %v1474_v7, %s1649_s29 }
 0x5f0   : > { %v908_v46 = vpop.permute.xlu1 %907 }
 0x5f1   : > { %1359 = vmatmul.msk.f32.vlgmr.msra.gmra.mxu3 %vm556_vm0, %v908_v46 }
 0x5f8   : > { %v910_v48 = vpop.permute.xlu0 %909 }
 0x5f9   : > { %1360 = vmatmul.msk.f32.gmra.mxu3 %vm556_vm0, %v910_v48 }
 0x600   : > { %v1003_v18 = vpop.permute.xlu0 %1002 }
 0x674   : > { %v932_v49 = vpop.f32.mrf.mxu3 }
 0x675   : > { %v938_v50 = vmul.f32 0.125, %v932_v49 }
 0x677   : > { %1362 = vmatmul.msk.f32.vlgmr.msrb.gmra.mxu2 %vm859_vm3, %v938_v50 }
 0x67c   : > { %v935_v52 = vpop.f32.mrf.mxu3 }
 0x67d   : > { %v939_v8 = vmul.f32 0.125, %v935_v52 }
 0x67f   : > { %1363 = vmatmul.msk.f32.gmra.mxu2 %vm859_vm3, %v939_v8 }
 0x6fa   : > { %v963_v53 = vpop.f32.mrf.mxu2 }
 0x6fb   : > { %v964_v54 = vadd.f32 1e-05, %v963_v53  ;;  %v1383_v53 = vld [vmem:[%s2099_s12 + $0x10] sm:$0xf] }
 0x6fd   : > { %1508 = vrsqrt.f32 %v964_v54  ;;  %vm975_vm5 = vweird.f32 %v964_v54 }
 0x702   : > { %v966_v55 = vpop.f32.mrf.mxu2 }
 0x703   : > { %v1509_v56 = vpop.eup %1508  ;;  %v967_v57 = vadd.f32 1e-05, %v966_v55 }
 0x704   : > { %v970_v58 = vmul.f32 %v1509_v56, %v964_v54  ;;  %vm976_vm4 = vweird.f32 %v1509_v56  ;;  %v1403_v54 = vld [vmem:[%s2099_s12 + $0x10] sm:$0x10] }
 0x705   : > { %1510 = vrsqrt.f32 %v967_v57  ;;  %vm977_vm6 = vmor %vm975_vm5, %vm976_vm4  ;;  %vm985_vm9 = vweird.f32 %v967_v57  ;;  %v1384_v55 = vor.u32 %v1403_v54, %v1383_v53 }
 0x706   : > { %v971_v59 = vmul.f32 %v1509_v56, %v970_v58 }
 0x708   : > { %v972_v60 = vmul.f32 0.5, %v971_v59 }
 0x70a   : > { %v973_v61 = vsub.f32 1.5, %v972_v60 }
 0x70b   : > { %v1511_v62 = vpop.eup %1510 }
 0x70c   : > { %v980_v63 = vmul.f32 %v1511_v62, %v967_v57  ;;  %v974_v1 = vmul.f32 %v1509_v56, %v973_v61  ;;  %vm986_vm7 = vweird.f32 %v1511_v62 }
 0x70d   : > { %vm987_vm10 = vmor %vm985_vm9, %vm986_vm7 }
 0x70e   : > { %v981_v3 = vmul.f32 %v1511_v62, %v980_v63  ;;  %v978_v4 = vsel %vm977_vm6, %v1509_v56, %v974_v1 }
 0x70f   : > { %991 = vrot.lane.b32.xlu2 %v978_v4, %s1649_s29 }
 0x710   : > { %v982_v5 = vmul.f32 0.5, %v981_v3 }
 0x712   : > { %v983_v6 = vsub.f32 1.5, %v982_v5 }
 0x714   : > { %v984_v10 = vmul.f32 %v1511_v62, %v983_v6 }
 0x716   : > { %v988_v12 = vsel %vm987_vm10, %v1511_v62, %v984_v10 }
 0x717   : > { %1010 = vrot.lane.b32.xlu2 %v1475_v9, %s1649_s29  ;;  %993 = vrot.lane.b32.xlu1 %v988_v12, %s1649_s29 }
 0x769   : > { %v992_v13 = vpop.permute.xlu2 %991 }
 0x76a   : > { %v997_v17 = vmul.f32 %v992_v13, %v901_v40 }
 0x76c   : > { %v1005_v23 = vmul.f32 %v1003_v18, %v997_v17 }
 0x771   : > { %v1011_v22 = vpop.permute.xlu2 %1010 }
 0x772   : > { %v1013_v25 = vadd.f32 %v1011_v22, %v1005_v23 }
 0x789   : > { %v994_v19 = vpop.permute.xlu1 %993 }
 0x78a   : > { %v998_v21 = vmul.f32 %v994_v19, %v902_v43 }
 0x78c   : > { %v1006_v24 = vmul.f32 %v1003_v18, %v998_v21 }
 0x78e   : > { %v1014_v26 = vadd.f32 %v1011_v22, %v1006_v24 }
 0x790   : > { %v1015_v27 = vpack.c.bf16 %v1014_v26, %v1013_v25 }
 0x792   : > { %1025 = vrot.lane.b32.xlu1 %v1015_v27, %s1651_s26  ;;  %s1652_s26 = smov 86  }
 0x79a   : > { %1140 = vrot.lane.b32.xlu1 %v1924_v44, %s1649_s29 }
 0x7a2   : > { %1148 = vrot.lane.b32.xlu1 %v1953_v28, %s1649_s29 }
 0x804   : > { %v1026_v29 = vpop.permute.xlu1 %1025 }
 0x805   : > { %1372 = vmatmul.msk.bf16.vlgmr.msrb.gmra.mxu1 %vm556_vm0, %v1026_v29 }
 0x80c   : > { %v1141_v56 = vpop.permute.xlu1 %1140 }
 0x80d   : > { %v1158_v6 = vsel %vm556_vm0, %v1141_v56, %v1920_v39 }
 0x814   : > { %v1149_v63 = vpop.permute.xlu1 %1148 }
 0x882   : > { %v1051_v31 = vpop.f32.mrf.mxu1 }
 0x883   : > { %v1052_v32 = vadd.f32 %v1476_v30, %v1051_v31 }
 0x885   : > { %v1056_v33 = vmul.f32 %v1052_v32, %v1052_v32 }
 0x887   : > { %v1058_v34 = vmul.f32 %v1056_v33, %v1052_v32 }
 0x889   : > { %v1060_v35 = vmul.f32 0.044715, %v1058_v34 }
 0x88a   : > { %v1053_v36 = vpop.f32.mrf.mxu1 }
 0x88b   : > { %v1054_v37 = vadd.f32 %v1476_v30, %v1053_v36  ;;  %v1062_v38 = vadd.f32 %v1060_v35, %v1052_v32 }
 0x88d   : > { %v1057_v40 = vmul.f32 %v1054_v37, %v1054_v37  ;;  %v1064_v44 = vmul.f32 0.7978846, %v1062_v38 }
 0x88f   : > { %1512 = vtanh.f32 %v1064_v44  ;;  %v1059_v41 = vmul.f32 %v1057_v40, %v1054_v37 }
 0x891   : > { %v1061_v28 = vmul.f32 0.044715, %v1059_v41 }
 0x893   : > { %v1063_v42 = vadd.f32 %v1061_v28, %v1054_v37 }
 0x895   : > { %v1513_v43 = vpop.eup %1512  ;;  %v1065_v45 = vmul.f32 0.7978846, %v1063_v42 }
 0x896   : > { %v1068_v46 = vadd.f32 1.0, %v1513_v43 }
 0x897   : > { %1514 = vtanh.f32 %v1065_v45 }
 0x898   : > { %v1070_v48 = vmul.f32 0.5, %v1068_v46 }
 0x89a   : > { %v1072_v7 = vmul.f32 %v1070_v48, %v1052_v32 }
 0x89c   : > { %1076 = vrot.lane.b32.xlu0 %v1072_v7, %s1652_s26 }
 0x89d   : > { %v1515_v49 = vpop.eup %1514 }
 0x89e   : > { %v1069_v50 = vadd.f32 1.0, %v1515_v49 }
 0x8a0   : > { %v1071_v52 = vmul.f32 0.5, %v1069_v50 }
 0x8a2   : > { %v1073_v8 = vmul.f32 %v1071_v52, %v1054_v37 }
 0x8a4   : > { %1078 = vrot.lane.b32.xlu2 %v1073_v8, %s1652_s26  ;;  %1142 = vrot.lane.b32.xlu0 %v1931_v51, %s1649_s29  ;;  %v1118_v51 = vsel %vm1116_vm11, %v1384_v55, 0 }
 0x8a5   : > { %1125 = vmatpush.bf16.msrb.mxu3 %v1118_v51 }
 0x8ac   : > { %1146 = vrot.lane.b32.xlu2 %v1949_v20, %s1649_s29  ;;  %1152 = vrot.lane.b32.xlu0 %v1898_v11, %s1650_s27  ;;  %v1402_v20 = vld [vmem:[%s2099_s12 + $0x8] sm:$0xff]  ;;  %v1401_v11 = vld [vmem:[%s2099_s12] sm:$0xff]  ;;  %s1173_s29 = scalar_lea.sflag [#allocation7], %s1821_s23 }
 0x8ad   : > { %1126 = vmatpush.bf16.msrb.mxu3 %v1402_v20 }
 0x8b1   : > { %1127 = vmatpush.bf16.msrb.mxu3 %v1401_v11 }
 0x8b4   : > { %1154 = vrot.lane.b32.xlu2 %v1903_v15, %s1650_s27  ;;  %s541_s27 = scalar_lea.vmem [#allocation6], %s1824_s30 }
 0x8b5   : > { %s1202_s17 = sshll.u32 %s541_s27, 4  ;;  %s1203_s17 = int_to_ptr.vmem [resolvable:$true] %s1202_s17 }
 0x8fe   : > { %v1079_v15 = vpop.permute.xlu2 %1078 }
 0x8ff   : > { %v1083_v59 = vadd.f32 %v1079_v15, %v1054_v37 }
 0x906   : > { %v1147_v57 = vpop.permute.xlu2 %1146 }
 0x907   : > { %v1160_v9 = vsel %vm667_vm8, %v1158_v6, %v1147_v57 }
 0x90e   : > { %v1077_v58 = vpop.permute.xlu0 %1076  ;;  %v1155_v3 = vpop.permute.xlu2 %1154 }
 0x90f   : > { %v1082_v60 = vadd.f32 %v1077_v58, %v1052_v32 }
 0x911   : > { %v1084_v61 = vpack.c.bf16 %v1083_v59, %v1082_v60 }
 0x913   : > { %1385 = vmatmul.msk.bf16.vlgmr.msrb.gmra.mxu3 %vm1112_vm12, %v1084_v61 }
 0x916   : > { %v1143_v62 = vpop.permute.xlu0 %1142 }
 0x917   : > { %v1159_v1 = vsel %vm556_vm0, %v1143_v62, %v1926_v47 }
 0x918   : > { %v1161_v4 = vsel %vm667_vm8, %v1159_v1, %v1149_v63 }
 0x919   : > { %v1164_v5 = vsel %vm1162_vm13, %v1161_v4, %v1155_v3 }
 0x91a   : > { %1166 = vst [vmem:[%s541_s27 + $0x8] sm:$0xff] %v1164_v5 }
 0x91e   : > { %v1153_v10 = vpop.permute.xlu0 %1152 }
 0x91f   : > { %v1163_v12 = vsel %vm1162_vm13, %v1160_v9, %v1153_v10 }
 0x920   : > { %1165 = vst [vmem:[%s541_s27] sm:$0xff] %v1163_v12 }
 0x921   : > { %1573 = shalt.err (!%p1570_p7)
}
 0x922   : > { %s1653_s26 = smov 128   ;;  %s1654_s16 = smov 8  }
 0x923   : > { %1409 = dma.vmem_to_hbm [thread:$0]  (%p1785_p11), %s1203_s17, 256, %s1205_s15, %s1173_s29, %s1653_s26, %s1653_s26, %s1654_s16  }
 0x924   : > { %s2135_s1 = sld [smem:[#allocation20_spill]]  ;;  %s534_s2 = scalar_lea.vmem [#allocation5], %s1824_s30 }
 0x925   : > { %s2136_s24 = sld [smem:[#allocation21_spill]]  ;;  %s1185_s27 = sshll.u32 %s534_s2, 4  ;;  %s1186_s27 = int_to_ptr.vmem [resolvable:$true] %s1185_s27 }
 0x926   : > { %s1168_s15 = scalar_lea.sflag [#allocation4], %s1821_s23 }
 0x92a   : > { %v1477_v39 = vld [vmem:[%s2135_s1] ss:$0 sm:$0xff] }
 0x92b   : > { %s1184_s22 = scalar_lea.hbm %s2136_s24, %s1404_s25  ;;  %s1594_s0 = scalar_lea.hbm %s2136_s24, 32 }
 0x92c   : > { %s1187_s17 = sshll.u32 %s1184_s22, 4  ;;  %s1188_s17 = int_to_ptr.hbm [resolvable:$true] %s1187_s17 }
 0x92d   : > { %s1588_s29 = sshra.s32 %s1188_s17, 4  ;;  %s1589_s29 = int_to_ptr.hbm [resolvable:$true] %s1588_s29 }
 0x92e   : > { %s1590_s30 = scalar_lea.hbm %s1589_s29, 16  ;;  %p1595_p2 = scmp.lt.s32.totalorder %s1589_s29, %s2136_s24 }
 0x92f   : > { %p1591_p5 = scmp.ne.s32.totalorder %s1589_s29, %s1590_s30  ;;  %p1596_p9 = scmp.lt.s32.totalorder %s1594_s0, %s1590_s30 }
 0x931   : > { %p1592_p8 = pnand %p1591_p5, %p1785_p11  ;;  %p1597_p6 = por %p1596_p9, %p1595_p2 }
 0x933   : > { %p1593_p10 = pneg %p1592_p8 }
 0x935   : > { %p1598_p13 = pnand %p1597_p6, %p1593_p10 }
 0x996   : > { %v1129_v47 = vpop.f32.mrf.mxu3 }
 0x997   : > { %v1130_v13 = vadd.f32 %v1477_v39, %v1129_v47 }
 0x999   : > { %v1134_v14 = vadd.f32 %v1130_v13, %v1836_v0 }
 0x99b   : > { %1136 = vst.msk [vmem:[%s534_s2] sm:$0xff] %vm556_vm0, %v1134_v14 }
 0x99e   : > { %v1131_v16 = vpop.f32.mrf.mxu3 }
 0x99f   : > { %v1132_v17 = vadd.f32 %v1477_v39, %v1131_v16 }
 0x9a1   : > { %v1135_v18 = vadd.f32 %v1132_v17, %v1840_v2 }
 0x9a3   : > { %1137 = vst.msk [vmem:[%s534_s2 + $0x8] sm:$0xff] %vm556_vm0, %v1135_v18 }
 0x9a4   : > { %1601 = shalt.err (!%p1598_p13)
}
 0x9a5   : > { %1408 = dma.vmem_to_hbm [thread:$0]  (%p1785_p11), %s1186_s27, 256, %s1188_s17, %s1168_s15, %s1653_s26, %s1653_s26, %s1654_s16  }
 0x9a6 PF: > { %s2137_s23 = sld [smem:[#allocation11_spill]]  ;;  %p2139_p0 = scmp.ge.s32.totalorder %s1644_s21, 2 }
 0x9a8   : > { %p1417_p1 = pnand %p2139_p0, %p1789_p12 }
 0x9aa   : > { %p1418_p3 = pneg %p1417_p1 }
 0x9ac   : > { %s1219_s20 = sand.u32 1, %s2137_s23  }
 0x9ad   : > { %s1220_s22 = scalar_lea.sflag [#allocation4], %s1219_s20 }
 0x9ae   : > { %1623 = dma.done.wait (%p1418_p3), %s1220_s22, 256  }
 0x9af   : > { %1625 = vsyncadd (%p1418_p3), %s1220_s22, 4294967040  ;;  %s1230_s29 = scalar_lea.sflag [#allocation7], %s1219_s20 }
 0x9b0   : > { %1627 = dma.done.wait (%p1418_p3), %s1230_s29, 256  }
 0x9b1   : > { %1629 = vsyncadd (%p1418_p3), %s1230_s29, 4294967040  ;;  %s2140_s21 = sld [smem:[#allocation13_spill]]  ;;  %s2143_s18 = smov %s1636_s19 }
 0x9b2   : > { %s2141_s28 = sld [smem:[#allocation12_spill]] }
 0x9b3   : > { %s2142_s20 = sld [smem:[#allocation14_spill]] }
 0x9b7   : > { %p32_p11 = scmp.ge.s32.totalorder %s2140_s21, 4  }
 0x9b8   : > { %s2144_s19 = smov %s2141_s28 }
 0x9b9   :  { %34 = sbr.rel (!%p32_p11) target bundleno = 14 (0xe), region = 141 }
 0x9be   :  { %1236 = vsyncpa [#allocation3], 1 }
 0x9bf   :  { %1238 = vsyncpa [#allocation3 + $0x1], 1 }
 0x9c0   :  { %1239 = vsyncpa [#allocation4], 1 }
 0x9c1   :  { %1241 = vsyncpa [#allocation4 + $0x1], 1 }
 0x9c2   :  { %1242 = vsyncpa [#allocation7], 1 }
 0x9c3   :  { %1244 = vsyncpa [#allocation7 + $0x1], 1 }

</bundles_post_ra>
